<compile_context>
chip_gen: v5e
topology: v5e:2x2
jax: 0.10.0
libtpu: 0.0.40
codegen_flags: <defaults>
</compile_context>

<pallas_src>
import jax
import jax.numpy as jnp
from jax import lax
from jax.experimental import pallas as pl
from jax.experimental.pallas import tpu as pltpu


# ---------------------------------------------------------------------------
# Kernels
# ---------------------------------------------------------------------------

def _linear_single_block_kernel(x_ref, w_ref, o_ref):
    """Whole problem resident in VMEM: o = x @ w.T in one MXU call."""
    o_ref[...] = lax.dot_general(
        x_ref[...], w_ref[...],
        dimension_numbers=(((1,), (1,)), ((), ())),   # contract K of x with K of w
        preferred_element_type=jnp.float32,
    ).astype(o_ref.dtype)


def _linear_tiled_kernel(x_ref, w_ref, o_ref, acc_ref):
    """Tiled matmul with f32 accumulator; K is the trailing 'arbitrary' axis."""
    @pl.when(pl.program_id(2) == 0)
    def _():
        acc_ref[...] = jnp.zeros_like(acc_ref)

    acc_ref[...] += lax.dot_general(
        x_ref[...], w_ref[...],                       # x: (tm, tk), w: (tn, tk)
        dimension_numbers=(((1,), (1,)), ((), ())),   # contract last dims -> (tm, tn)
        preferred_element_type=jnp.float32,
    )

    @pl.when(pl.program_id(2) == pl.num_programs(2) - 1)
    def _():
        o_ref[...] = acc_ref[...].astype(o_ref.dtype)


# ---------------------------------------------------------------------------
# Wrapper
# ---------------------------------------------------------------------------

def _pick_tile(dim, preferred, align):
    """Largest t <= preferred with dim % t == 0 and t % align == 0; else full dim.

    Full extent is always a legal block shape, so non-divisible / awkward dims
    fall back to a single block along that axis instead of masked partial stores.
    """
    t = min(preferred, dim)
    t = (t // align) * align
    while t >= align:
        if dim % t == 0:
            return t
        t -= align
    return dim


# Below this footprint (x + weight + out, f32) we skip the grid entirely.
_SINGLE_BLOCK_BYTES = 4 * 1024 * 1024


def softmax_linear(x, weight, *, tm=256, tn=256, tk=256):
    """Pallas equivalent of softmaxLinear.forward: x @ weight.T (no bias).

    x:      (M, in_features)            float32
    weight: (out_features, in_features) float32  -- PyTorch layout, NOT transposed
    returns (M, out_features)           float32
    """
    M, K = x.shape
    N, K2 = weight.shape
    assert K == K2, "in_features mismatch"

    out_shape = jax.ShapeDtypeStruct((M, N), x.dtype)
    total_bytes = 4 * (M * K + N * K + M * N)

    if total_bytes <= _SINGLE_BLOCK_BYTES:
        # Single block: one MXU call, no accumulator, no per-step grid overhead.
        return pl.pallas_call(
            _linear_single_block_kernel,
            out_shape=out_shape,
            grid_spec=pltpu.PrefetchScalarGridSpec(
                num_scalar_prefetch=0,
                grid=(1,),
                in_specs=[
                    pl.BlockSpec((M, K), lambda i: (0, 0)),
                    pl.BlockSpec((N, K), lambda i: (0, 0)),
                ],
                out_specs=pl.BlockSpec((M, N), lambda i: (0, 0)),
            ),
            compiler_params=pltpu.CompilerParams(
                dimension_semantics=("arbitrary",),
            ),
        )(x, weight)

    # Tiled path. tm capped (multiple of 8), tn/tk 128-aligned (256 preferred
    # for the 256x256 MXUs on v6e/v7x); fall back to full extent if needed.
    tm = _pick_tile(M, tm, 8)
    tn = _pick_tile(N, tn, 128)
    tk = _pick_tile(K, tk, 128)

    grid = (M // tm, N // tn, K // tk)

    return pl.pallas_call(
        _linear_tiled_kernel,
        out_shape=out_shape,
        grid_spec=pltpu.PrefetchScalarGridSpec(
            num_scalar_prefetch=0,
            grid=grid,
            in_specs=[
                pl.BlockSpec((tm, tk), lambda i, j, k: (i, k)),
                # Streamed (bandwidth-bound) operand: triple-buffer its tiles.
                pl.BlockSpec((tn, tk), lambda i, j, k: (j, k),
                             pipeline_mode=pl.Buffered(3)),
            ],
            out_specs=pl.BlockSpec((tm, tn), lambda i, j, k: (i, j)),
            scratch_shapes=[pltpu.VMEM((tm, tn), jnp.float32)],
        ),
        compiler_params=pltpu.CompilerParams(
            dimension_semantics=("parallel", "parallel", "arbitrary"),
            vmem_limit_bytes=32 * 1024 * 1024,  # safe on v5e/v6e/v7x
        ),
    )(x, weight)


def init_softmax_linear_weight(key, in_features, out_features):
    """Replicates the PyTorch init:
    uniform(-1,1) then renorm_(2, dim=1, maxnorm=1e-5).mul_(1e5)
    -> each column (slice along dim=1) ends up with L2 norm == 1."""
    w = jax.random.uniform(
        key, (out_features, in_features), minval=-1.0, maxval=1.0,
        dtype=jnp.float32,
    )
    col_norm = jnp.sqrt(jnp.sum(w * w, axis=0, keepdims=True))  # (1, in_features)
    w = jnp.where(col_norm > 1e-5, w / col_norm, w * 1e5)
    return w


if __name__ == "__main__":
    key = jax.random.PRNGKey(0)
    k_x, k_w, k_x2, k_w2 = jax.random.split(key, 4)

    # --- Small shape: exercises the single-block fast path -----------------
    batch, in_features, out_features = 16, 256, 256
    x = jax.random.normal(k_x, (batch, in_features), dtype=jnp.float32)
    weight = init_softmax_linear_weight(k_w, in_features, out_features)

    out = jax.block_until_ready(softmax_linear(x, weight))
    ref = x @ weight.T
    assert out.shape == (batch, out_features)
    assert jnp.allclose(out, ref, atol=1e-4, rtol=1e-4), "mismatch (small path)"

    # --- Larger shape: exercises the tiled / multi-core path ----------------
    M2, K2, N2 = 512, 512, 1024
    x2 = jax.random.normal(k_x2, (M2, K2), dtype=jnp.float32)
    w2 = init_softmax_linear_weight(k_w2, K2, N2)

    out2 = jax.block_until_ready(softmax_linear(x2, w2))
    ref2 = x2 @ w2.T
    assert out2.shape == (M2, N2)
    assert jnp.allclose(out2, ref2, atol=1e-3, rtol=1e-3), "mismatch (tiled path)"

    print("KERNEL_OK")
</pallas_src>

<mosaic_0001>
module attributes {stable_mosaic.version = 11 : i64} {
  func.func @_linear_single_block_kernel(%arg0: i32, %arg1: memref<16x256xf32, #tpu.memory_space<vmem>>, %arg2: memref<256x256xf32, #tpu.memory_space<vmem>>, %arg3: memref<16x256xf32, #tpu.memory_space<vmem>>) attributes {dimension_semantics = [#tpu.dimension_semantics<arbitrary>], iteration_bounds = array<i64: 1>, scalar_prefetch = 0 : i64, scratch_operands = 0 : i64, tpu.core_type = #tpu.core_type<tc>, window_params = [{pipeline_mode = #tpu.pipeline_mode<synchronous>, transform_indices = @transform_0, window_bounds = array<i64: 16, 256>}, {pipeline_mode = #tpu.pipeline_mode<synchronous>, transform_indices = @transform_1, window_bounds = array<i64: 256, 256>}, {pipeline_mode = #tpu.pipeline_mode<synchronous>, transform_indices = @transform_2, window_bounds = array<i64: 16, 256>}]} {
    %c0 = arith.constant 0 : index
    %c0_0 = arith.constant 0 : index
    %0 = vector.load %arg1[%c0, %c0_0] : memref<16x256xf32, #tpu.memory_space<vmem>>, vector<16x256xf32>
    %c0_1 = arith.constant 0 : index
    %c0_2 = arith.constant 0 : index
    %1 = vector.load %arg2[%c0_1, %c0_2] : memref<256x256xf32, #tpu.memory_space<vmem>>, vector<256x256xf32>
    %cst = arith.constant dense<0.000000e+00> : vector<16x256xf32>
    %2 = tpu.matmul %0, %1, %cst {dimension_numbers = #tpu.dot_dimension_numbers<[1], [1], [0], [0], [0, 0, 1, 0], [], []>} : vector<16x256xf32>, vector<256x256xf32>, vector<16x256xf32> -> vector<16x256xf32>
    %c0_3 = arith.constant 0 : index
    %c0_4 = arith.constant 0 : index
    %3 = vector.load %arg3[%c0_3, %c0_4] : memref<16x256xf32, #tpu.memory_space<vmem>>, vector<16x256xf32>
    tpu.vector_store %arg3[%c0_3, %c0_4], %2 {strides = array<i32>} : memref<16x256xf32, #tpu.memory_space<vmem>>, vector<16x256xf32>,
    return
  }
  func.func @transform_0(%arg0: i32) -> (i32, i32) {
    %c0_i32 = arith.constant 0 : i32
    %c0_i32_0 = arith.constant 0 : i32
    %c0_i32_1 = arith.constant 0 : i32
    return %c0_i32, %c0_i32_0 : i32, i32
  }
  func.func @transform_1(%arg0: i32) -> (i32, i32) {
    %c0_i32 = arith.constant 0 : i32
    %c0_i32_0 = arith.constant 0 : i32
    %c0_i32_1 = arith.constant 0 : i32
    return %c0_i32, %c0_i32_0 : i32, i32
  }
  func.func @transform_2(%arg0: i32) -> (i32, i32) {
    %c0_i32 = arith.constant 0 : i32
    %c0_i32_0 = arith.constant 0 : i32
    %c0_i32_1 = arith.constant 0 : i32
    return %c0_i32, %c0_i32_0 : i32, i32
  }
}

</mosaic_0001>

<bundles_post_ra>
// kernel: tpu_custom_call.1
= control target key start
LH: loop header
LB: loop body
LE: loop exit
PB: predicated region body
PF: predicated region fallthrough
CT: control target
= control target key end

     0   :  { %7 = vsyncpa [#allocation3], 0  ;;  %s349_s0 = inlined_call_operand.hbm [shape: f32[16,256], index: 0, kind: input, shape index: {}]   ;;  %s350_s1 = inlined_call_operand.hbm [shape: f32[256,256], index: 1, kind: input, shape index: {}]   ;;  %s351_s2 = inlined_call_operand.hbm [shape: f32[16,256], index: 2, kind: output, shape index: {}]  }
   0x1   :  { %8 = vsyncpa [#allocation6], 0 }
   0x2   :  { %9 = vsyncpa [#allocation4], 0  ;;  %s14_s11 = sshll.u32 %s349_s0, 4  ;;  %s311_s12 = smov [#allocation2]   ;;  %s15_s11 = int_to_ptr.hbm [resolvable:$true] %s14_s11 }
   0x3   :  { %s16_s13 = sshll.u32 %s311_s12, 4  ;;  %s27_s16 = sshll.u32 %s350_s1, 4  ;;  %s17_s13 = int_to_ptr.vmem [resolvable:$true] %s16_s13  ;;  %s28_s16 = int_to_ptr.hbm [resolvable:$true] %s27_s16 }
   0x4   :  { %s312_s17 = smov 256   ;;  %s313_s18 = smov 16  }
   0x5   :  { %22 = dma.hbm_to_vmem [thread:$0]  %s15_s11, 512, %s17_s13, [#allocation3], %s312_s17, %s312_s17, %s313_s18  }
   0x6   :  { %s314_s19 = smov [#allocation5]  }
   0x7   :  { %s29_s20 = sshll.u32 %s314_s19, 4  ;;  %s30_s20 = int_to_ptr.vmem [resolvable:$true] %s29_s20 }
   0x8   :  { %35 = dma.hbm_to_vmem [thread:$0]  %s28_s16, 8192, %s30_s20, [#allocation6], %s312_s17, %s312_s17, %s313_s18  }
   0x9   :  { %305 = dma.done.wait [#allocation3], 512  }
   0xa   :  { %306 = vsyncadd [#allocation3], 4294966784 }
   0xb   :  { %307 = dma.done.wait [#allocation6], 8192  }
   0xc   :  { %308 = vsyncadd [#allocation6], 4294959104  ;;  %v110_v0 = vld [vmem:[#allocation5 + $0x1f0] sm:$0xff]  ;;  %v111_v1 = vld [vmem:[#allocation5 + $0x1f8] sm:$0xff]  ;;  %s315_s0 = smov [#allocation7]   ;;  %s214_s23 = sshll.u32 %s351_s2, 4  ;;  %s215_s23 = int_to_ptr.hbm [resolvable:$true] %s214_s23 }
   0xd   :  { %158 = vmatpush.xpose.msra.mxu2 %v110_v0  ;;  %181 = vmatpush.xpose.msra.mxu3 %v111_v1  ;;  %v78_v2 = vld [vmem:[#allocation5 + $0xf0] sm:$0xff]  ;;  %v79_v3 = vld [vmem:[#allocation5 + $0xf8] sm:$0xff]  ;;  %v108_v4 = vld [vmem:[#allocation5 + $0x1e0] sm:$0xff]  ;;  %s212_s1 = sshll.u32 %s315_s0, 4  ;;  %s213_s1 = int_to_ptr.vmem [resolvable:$true] %s212_s1 }
   0xe   :  { %v109_v5 = vld [vmem:[#allocation5 + $0x1e8] sm:$0xff]  ;;  %112 = vmatpush.xpose.msra.mxu0 %v78_v2  ;;  %135 = vmatpush.xpose.msra.mxu1 %v79_v3  ;;  %v76_v6 = vld [vmem:[#allocation5 + $0xe0] sm:$0xff]  ;;  %v106_v8 = vld [vmem:[#allocation5 + $0x1d0] sm:$0xff] }
   0xf   :  { %v77_v7 = vld [vmem:[#allocation5 + $0xe8] sm:$0xff]  ;;  %v107_v9 = vld [vmem:[#allocation5 + $0x1d8] sm:$0xff]  ;;  %v74_v10 = vld [vmem:[#allocation5 + $0xd0] sm:$0xff] }
  0x10   :  { %v75_v11 = vld [vmem:[#allocation5 + $0xd8] sm:$0xff]  ;;  %v104_v12 = vld [vmem:[#allocation5 + $0x1c0] sm:$0xff]  ;;  %v105_v13 = vld [vmem:[#allocation5 + $0x1c8] sm:$0xff] }
  0x11   :  { %159 = vmatpush.xpose.msra.mxu2 %v108_v4  ;;  %182 = vmatpush.xpose.msra.mxu3 %v109_v5  ;;  %v72_v14 = vld [vmem:[#allocation5 + $0xc0] sm:$0xff]  ;;  %v73_v15 = vld [vmem:[#allocation5 + $0xc8] sm:$0xff]  ;;  %v102_v16 = vld [vmem:[#allocation5 + $0x1b0] sm:$0xff] }
  0x12   :  { %113 = vmatpush.xpose.msra.mxu0 %v76_v6  ;;  %136 = vmatpush.xpose.msra.mxu1 %v77_v7  ;;  %v103_v17 = vld [vmem:[#allocation5 + $0x1b8] sm:$0xff]  ;;  %v70_v18 = vld [vmem:[#allocation5 + $0xb0] sm:$0xff]  ;;  %v100_v20 = vld [vmem:[#allocation5 + $0x1a0] sm:$0xff] }
  0x13   :  { %v71_v19 = vld [vmem:[#allocation5 + $0xb8] sm:$0xff]  ;;  %v101_v21 = vld [vmem:[#allocation5 + $0x1a8] sm:$0xff]  ;;  %v68_v22 = vld [vmem:[#allocation5 + $0xa0] sm:$0xff] }
  0x14   :  { %v69_v23 = vld [vmem:[#allocation5 + $0xa8] sm:$0xff]  ;;  %v98_v24 = vld [vmem:[#allocation5 + $0x190] sm:$0xff]  ;;  %v99_v25 = vld [vmem:[#allocation5 + $0x198] sm:$0xff] }
  0x15   :  { %160 = vmatpush.xpose.msra.mxu2 %v106_v8  ;;  %183 = vmatpush.xpose.msra.mxu3 %v107_v9  ;;  %v66_v26 = vld [vmem:[#allocation5 + $0x90] sm:$0xff]  ;;  %v67_v27 = vld [vmem:[#allocation5 + $0x98] sm:$0xff]  ;;  %v96_v28 = vld [vmem:[#allocation5 + $0x180] sm:$0xff] }
  0x16   :  { %114 = vmatpush.xpose.msra.mxu0 %v74_v10  ;;  %137 = vmatpush.xpose.msra.mxu1 %v75_v11  ;;  %v97_v29 = vld [vmem:[#allocation5 + $0x188] sm:$0xff]  ;;  %v64_v30 = vld [vmem:[#allocation5 + $0x80] sm:$0xff]  ;;  %v94_v32 = vld [vmem:[#allocation5 + $0x170] sm:$0xff] }
  0x17   :  { %v65_v31 = vld [vmem:[#allocation5 + $0x88] sm:$0xff]  ;;  %v95_v33 = vld [vmem:[#allocation5 + $0x178] sm:$0xff]  ;;  %v62_v34 = vld [vmem:[#allocation5 + $0x70] sm:$0xff] }
  0x18   :  { %v63_v35 = vld [vmem:[#allocation5 + $0x78] sm:$0xff]  ;;  %v92_v36 = vld [vmem:[#allocation5 + $0x160] sm:$0xff]  ;;  %v93_v37 = vld [vmem:[#allocation5 + $0x168] sm:$0xff] }
  0x19   :  { %161 = vmatpush.xpose.msra.mxu2 %v104_v12  ;;  %184 = vmatpush.xpose.msra.mxu3 %v105_v13  ;;  %v60_v38 = vld [vmem:[#allocation5 + $0x60] sm:$0xff]  ;;  %v61_v39 = vld [vmem:[#allocation5 + $0x68] sm:$0xff]  ;;  %v90_v40 = vld [vmem:[#allocation5 + $0x150] sm:$0xff] }
  0x1a   :  { %115 = vmatpush.xpose.msra.mxu0 %v72_v14  ;;  %138 = vmatpush.xpose.msra.mxu1 %v73_v15  ;;  %v91_v41 = vld [vmem:[#allocation5 + $0x158] sm:$0xff]  ;;  %v58_v42 = vld [vmem:[#allocation5 + $0x50] sm:$0xff]  ;;  %v88_v44 = vld [vmem:[#allocation5 + $0x140] sm:$0xff] }
  0x1b   :  { %v59_v43 = vld [vmem:[#allocation5 + $0x58] sm:$0xff]  ;;  %v89_v45 = vld [vmem:[#allocation5 + $0x148] sm:$0xff]  ;;  %v56_v46 = vld [vmem:[#allocation5 + $0x40] sm:$0xff] }
  0x1c   :  { %v57_v47 = vld [vmem:[#allocation5 + $0x48] sm:$0xff]  ;;  %v86_v48 = vld [vmem:[#allocation5 + $0x130] sm:$0xff]  ;;  %v87_v49 = vld [vmem:[#allocation5 + $0x138] sm:$0xff] }
  0x1d   :  { %162 = vmatpush.xpose.msra.mxu2 %v102_v16  ;;  %185 = vmatpush.xpose.msra.mxu3 %v103_v17  ;;  %v54_v50 = vld [vmem:[#allocation5 + $0x30] sm:$0xff]  ;;  %v55_v51 = vld [vmem:[#allocation5 + $0x38] sm:$0xff]  ;;  %v84_v52 = vld [vmem:[#allocation5 + $0x120] sm:$0xff] }
  0x1e   :  { %116 = vmatpush.xpose.msra.mxu0 %v70_v18  ;;  %139 = vmatpush.xpose.msra.mxu1 %v71_v19  ;;  %v85_v53 = vld [vmem:[#allocation5 + $0x128] sm:$0xff]  ;;  %v52_v54 = vld [vmem:[#allocation5 + $0x20] sm:$0xff]  ;;  %v82_v56 = vld [vmem:[#allocation5 + $0x110] sm:$0xff] }
  0x1f   :  { %v53_v55 = vld [vmem:[#allocation5 + $0x28] sm:$0xff]  ;;  %v83_v57 = vld [vmem:[#allocation5 + $0x118] sm:$0xff]  ;;  %v50_v58 = vld [vmem:[#allocation5 + $0x10] sm:$0xff] }
  0x20   :  { %v51_v59 = vld [vmem:[#allocation5 + $0x18] sm:$0xff]  ;;  %v80_v60 = vld [vmem:[#allocation5 + $0x100] sm:$0xff]  ;;  %v81_v61 = vld [vmem:[#allocation5 + $0x108] sm:$0xff] }
  0x21   :  { %163 = vmatpush.xpose.msra.mxu2 %v100_v20  ;;  %186 = vmatpush.xpose.msra.mxu3 %v101_v21  ;;  %v48_v62 = vld [vmem:[#allocation5] sm:$0xff]  ;;  %v49_v63 = vld [vmem:[#allocation5 + $0x8] sm:$0xff]  ;;  %v46_v2 = vld [vmem:[#allocation2 + $0x10] sm:$0xff] }
  0x22   :  { %117 = vmatpush.xpose.msra.mxu0 %v68_v22  ;;  %140 = vmatpush.xpose.msra.mxu1 %v69_v23  ;;  %v44_v0 = vld [vmem:[#allocation2] sm:$0xff]  ;;  %v45_v1 = vld [vmem:[#allocation2 + $0x8] sm:$0xff]  ;;  %v47_v3 = vld [vmem:[#allocation2 + $0x18] sm:$0xff] }
  0x25   :  { %164 = vmatpush.xpose.msra.mxu2 %v98_v24  ;;  %187 = vmatpush.xpose.msra.mxu3 %v99_v25 }
  0x26   :  { %118 = vmatpush.xpose.msra.mxu0 %v66_v26  ;;  %141 = vmatpush.xpose.msra.mxu1 %v67_v27 }
  0x29   :  { %165 = vmatpush.xpose.msra.mxu2 %v96_v28  ;;  %188 = vmatpush.xpose.msra.mxu3 %v97_v29 }
  0x2a   :  { %119 = vmatpush.xpose.msra.mxu0 %v64_v30  ;;  %142 = vmatpush.xpose.msra.mxu1 %v65_v31 }
  0x2d   :  { %166 = vmatpush.xpose.msra.mxu2 %v94_v32  ;;  %189 = vmatpush.xpose.msra.mxu3 %v95_v33 }
  0x2e   :  { %120 = vmatpush.xpose.msra.mxu0 %v62_v34  ;;  %143 = vmatpush.xpose.msra.mxu1 %v63_v35 }
  0x31   :  { %167 = vmatpush.xpose.msra.mxu2 %v92_v36  ;;  %190 = vmatpush.xpose.msra.mxu3 %v93_v37 }
  0x32   :  { %121 = vmatpush.xpose.msra.mxu0 %v60_v38  ;;  %144 = vmatpush.xpose.msra.mxu1 %v61_v39 }
  0x35   :  { %168 = vmatpush.xpose.msra.mxu2 %v90_v40  ;;  %191 = vmatpush.xpose.msra.mxu3 %v91_v41 }
  0x36   :  { %122 = vmatpush.xpose.msra.mxu0 %v58_v42  ;;  %145 = vmatpush.xpose.msra.mxu1 %v59_v43 }
  0x39   :  { %169 = vmatpush.xpose.msra.mxu2 %v88_v44  ;;  %192 = vmatpush.xpose.msra.mxu3 %v89_v45 }
  0x3a   :  { %123 = vmatpush.xpose.msra.mxu0 %v56_v46  ;;  %146 = vmatpush.xpose.msra.mxu1 %v57_v47 }
  0x3d   :  { %170 = vmatpush.xpose.msra.mxu2 %v86_v48  ;;  %193 = vmatpush.xpose.msra.mxu3 %v87_v49 }
  0x3e   :  { %124 = vmatpush.xpose.msra.mxu0 %v54_v50  ;;  %147 = vmatpush.xpose.msra.mxu1 %v55_v51 }
  0x41   :  { %171 = vmatpush.xpose.msra.mxu2 %v84_v52  ;;  %194 = vmatpush.xpose.msra.mxu3 %v85_v53 }
  0x42   :  { %125 = vmatpush.xpose.msra.mxu0 %v52_v54  ;;  %148 = vmatpush.xpose.msra.mxu1 %v53_v55 }
  0x45   :  { %172 = vmatpush.xpose.msra.mxu2 %v82_v56  ;;  %195 = vmatpush.xpose.msra.mxu3 %v83_v57 }
  0x46   :  { %126 = vmatpush.xpose.msra.mxu0 %v50_v58  ;;  %149 = vmatpush.xpose.msra.mxu1 %v51_v59 }
  0x49   :  { %173 = vmatpush.xpose.msra.mxu2 %v80_v60  ;;  %196 = vmatpush.xpose.msra.mxu3 %v81_v61 }
  0x4a   :  { %127 = vmatpush.xpose.msra.mxu0 %v48_v62  ;;  %150 = vmatpush.xpose.msra.mxu1 %v49_v63 }
  0x4c   :  { %174 = vmatmul.f32.vlgmr.msra.gmra.mxu2 %v44_v0  ;;  %197 = vmatmul.f32.vlgmr.msra.gmra.mxu3 %v45_v1 }
  0x4d   :  { %128 = vmatmul.f32.vlgmr.msra.gmra.mxu0 %v44_v0  ;;  %151 = vmatmul.f32.vlgmr.msra.gmra.mxu1 %v45_v1 }
  0x54   :  { %177 = vmatmul.f32.gmra.mxu2 %v46_v2  ;;  %200 = vmatmul.f32.gmra.mxu3 %v47_v3 }
  0x55   :  { %131 = vmatmul.f32.gmra.mxu0 %v46_v2  ;;  %154 = vmatmul.f32.gmra.mxu1 %v47_v3 }
  0xca   :  { %v129_v4 = vpop.f32.mrf.mxu0  ;;  %v152_v5 = vpop.f32.mrf.mxu1 }
  0xcb   :  { %v153_v6 = vadd.f32 %v152_v5, %v129_v4 }
  0xcd   :  { %204 = vst [vmem:[#allocation7] sm:$0xff] %v153_v6 }
  0xcf   :  { %v175_v7 = vpop.f32.mrf.mxu2  ;;  %v198_v8 = vpop.f32.mrf.mxu3 }
  0xd0   :  { %v199_v9 = vadd.f32 %v198_v8, %v175_v7 }
  0xd2   :  { %205 = vst [vmem:[#allocation7 + $0x8] sm:$0xff] %v199_v9  ;;  %v132_v10 = vpop.f32.mrf.mxu0  ;;  %v155_v11 = vpop.f32.mrf.mxu1 }
  0xd3   :  { %v156_v12 = vadd.f32 %v155_v11, %v132_v10 }
  0xd5   :  { %206 = vst [vmem:[#allocation7 + $0x10] sm:$0xff] %v156_v12 }
  0xd7   :  { %v178_v13 = vpop.f32.mrf.mxu2  ;;  %v201_v14 = vpop.f32.mrf.mxu3 }
  0xd8   :  { %v202_v15 = vadd.f32 %v201_v14, %v178_v13 }
  0xda   :  { %207 = vst [vmem:[#allocation7 + $0x18] sm:$0xff] %v202_v15 }
  0xdb   :  { %220 = dma.vmem_to_hbm [thread:$0]  %s213_s1, 512, %s215_s23, [#allocation4], %s312_s17, %s312_s17, %s313_s18  }
  0xdc   :  { %309 = dma.done.wait [#allocation4], 512  }
  0xdd   :  { %310 = vsyncadd [#allocation4], 4294966784 }
  0xde   :  { %225 = vsyncpa [#allocation3], 1 }
  0xdf   :  { %226 = vsyncpa [#allocation6], 1 }
  0xe0   :  { %227 = vsyncpa [#allocation4], 1 }

</bundles_post_ra>
